<compile_context>
chip_gen: v7x
topology: tpu7x:2x2x1
jax: 0.10.0
libtpu: 0.0.40
codegen_flags: <defaults>
</compile_context>

<pallas_src>
import functools

import jax
import jax.numpy as jnp
from jax.experimental import pallas as pl
from jax.experimental.pallas import tpu as pltpu

EPS = 1e-5


def block_kernel(x_ref, w1_ref, g1_ref, b1_ref, w2_ref, g2_ref, b2_ref, r_ref,
                 o_ref, *, H, count):
    # x_ref : (N*H, W*C) f32, lane index = w*C + c  (lane-dense activations)
    # w*_ref: (3, W*C, W*C) bf16 banded conv weights (one slab per dy tap)
    # g*/b* : (1, W*C) f32  (per-channel BN affine, pre-tiled over w)
    # r_ref : (W*C, W*C) f32  channel reduce-and-broadcast matrix
    # o_ref : (N*H, W*C) f32
    NH, WC = x_ref.shape
    inv_count = 1.0 / count

    # Row-within-image masks implementing the height zero-padding (pad=1).
    row = jax.lax.broadcasted_iota(jnp.int32, (NH, 1), 0)
    not_top = (row % H != 0).astype(jnp.float32)       # row y-1 exists
    not_bot = (row % H != H - 1).astype(jnp.float32)   # row y+1 exists

    r_mat = r_ref[...]  # (WC, WC) f32

    def conv3x3(h, w_ref):
        # h: (NH, WC) f32. Width taps + width zero-pad are folded into the
        # block-tridiagonal weights, so only the dy row shifts are needed.
        zero_row = jnp.zeros((1, WC), jnp.float32)
        up = jnp.concatenate([zero_row, h[:NH - 1, :]], axis=0) * not_top  # y-1
        dn = jnp.concatenate([h[1:, :], zero_row], axis=0) * not_bot       # y+1
        acc = jnp.dot(up.astype(jnp.bfloat16), w_ref[0],
                      preferred_element_type=jnp.float32)
        acc = acc + jnp.dot(h.astype(jnp.bfloat16), w_ref[1],
                            preferred_element_type=jnp.float32)
        acc = acc + jnp.dot(dn.astype(jnp.bfloat16), w_ref[2],
                            preferred_element_type=jnp.float32)
        return acc  # (NH, WC) f32

    def channel_mean(v):
        # Per-channel mean over (N, H, W), broadcast back onto the (1, W*C)
        # lane layout. Sublane partial sums first, then mix the W lane-groups
        # with a tiny f32 matmul (r_mat = kron(ones(W,W), eye(C))).
        p = jnp.sum(v.reshape(NH // 8, 8, WC), axis=0)               # (8, WC)
        p = jnp.dot(p, r_mat, preferred_element_type=jnp.float32)    # (8, WC)
        return jnp.sum(p, axis=0, keepdims=True) * inv_count         # (1, WC)

    def bn(acc, g_ref, b_ref):
        # Training-mode BatchNorm, two-pass (numerically stable) variance.
        mean_b = channel_mean(acc)
        cen = acc - mean_b
        var_b = channel_mean(cen * cen)
        scale = jax.lax.rsqrt(var_b + EPS) * g_ref[...]
        return cen * scale + b_ref[...]

    # conv1 -> BN1 -> ReLU (all lane-dense, stays in vregs/VMEM)
    y1 = jnp.maximum(bn(conv3x3(x_ref[...], w1_ref), g1_ref, b1_ref), 0.0)
    # conv2 -> BN2 -> residual add (re-read x_ref here) -> ReLU
    y2 = bn(conv3x3(y1, w2_ref), g2_ref, b2_ref)
    o_ref[...] = jnp.maximum(y2 + x_ref[...], 0.0)


def _banded_conv_weights(w_hwio, W):
    """(3,3,Cin,Cout) HWIO -> (3, W*Cin, W*Cout) block-tridiagonal bf16.

    mats[dy][w_in*Cin + ci, w_out*Cout + co] = w[dy, w_in - w_out + 1, ci, co]
    when |w_in - w_out| <= 1, else 0 (missing rows == width zero padding).
    """
    _, _, cin, cout = w_hwio.shape
    mats = []
    for dy in range(3):
        m = jnp.zeros((W * cin, W * cout), jnp.float32)
        for dx in range(3):
            shift = jnp.eye(W, k=1 - dx, dtype=jnp.float32)  # w_in = w_out+dx-1
            m = m + jnp.kron(shift, w_hwio[dy, dx].astype(jnp.float32))
        mats.append(m)
    return jnp.stack(mats).astype(jnp.bfloat16)


def _channel_reduce_matrix(W, C):
    # R[w*C + c, w'*C + c'] = 1 iff c == c'  (sum over w, broadcast over w').
    return jnp.kron(jnp.ones((W, W), jnp.float32), jnp.eye(C, dtype=jnp.float32))


@jax.jit
def block_forward(x_nchw, w1, gamma1, beta1, w2, gamma2, beta2):
    """Forward pass of Block. x_nchw: (N, C, H, W) float32. Returns NCHW."""
    N, C, H, W = x_nchw.shape
    cout = w1.shape[-1]
    assert cout == C, "identity shortcut requires in_channels == out_channels"
    assert (N * H) % 8 == 0, "N*H must be a multiple of the sublane tile (8)"
    WC = W * cout

    # NCHW (PyTorch) -> lane-dense (N*H, W*C) for the kernel (boundary glue).
    x = jnp.transpose(x_nchw, (0, 2, 3, 1)).astype(jnp.float32).reshape(N * H, WC)

    wb1 = _banded_conv_weights(w1, W)
    wb2 = _banded_conv_weights(w2, W)
    g1 = jnp.tile(gamma1.reshape(1, cout).astype(jnp.float32), (1, W))
    b1 = jnp.tile(beta1.reshape(1, cout).astype(jnp.float32), (1, W))
    g2 = jnp.tile(gamma2.reshape(1, cout).astype(jnp.float32), (1, W))
    b2 = jnp.tile(beta2.reshape(1, cout).astype(jnp.float32), (1, W))
    rmat = _channel_reduce_matrix(W, cout)

    kernel = functools.partial(block_kernel, H=H, count=float(N * H * W))
    vmem = lambda: pl.BlockSpec(memory_space=pltpu.MemorySpace.VMEM)

    y = pl.pallas_call(
        kernel,
        out_shape=jax.ShapeDtypeStruct((N * H, WC), jnp.float32),
        in_specs=[vmem() for _ in range(8)],
        out_specs=vmem(),
    )(x, wb1, g1, b1, wb2, g2, b2, rmat)

    # lane-dense -> NCHW
    return jnp.transpose(y.reshape(N, H, W, cout), (0, 3, 1, 2))


def init_params(key, in_channels, out_channels):
    k1, k2, k3, k4, k5, k6 = jax.random.split(key, 6)
    fan_in1 = 9 * in_channels
    fan_in2 = 9 * out_channels
    w1 = jax.random.normal(k1, (3, 3, in_channels, out_channels), jnp.float32)
    w1 = w1 * (2.0 / fan_in1) ** 0.5
    w2 = jax.random.normal(k2, (3, 3, out_channels, out_channels), jnp.float32)
    w2 = w2 * (2.0 / fan_in2) ** 0.5
    gamma1 = 1.0 + 0.1 * jax.random.normal(k3, (1, out_channels), jnp.float32)
    beta1 = 0.1 * jax.random.normal(k4, (1, out_channels), jnp.float32)
    gamma2 = 1.0 + 0.1 * jax.random.normal(k5, (1, out_channels), jnp.float32)
    beta2 = 0.1 * jax.random.normal(k6, (1, out_channels), jnp.float32)
    return w1, gamma1, beta1, w2, gamma2, beta2


def reference_block(x_nchw, w1, g1, b1, w2, g2, b2):
    """Pure-JAX f32 reference of the PyTorch Block forward (training-mode BN)."""
    x = jnp.transpose(x_nchw, (0, 2, 3, 1)).astype(jnp.float32)

    def conv(h, w):
        return jax.lax.conv_general_dilated(
            h, w, window_strides=(1, 1), padding=((1, 1), (1, 1)),
            dimension_numbers=("NHWC", "HWIO", "NHWC"),
            precision=jax.lax.Precision.HIGHEST)

    def bn(h, g, b):
        m = jnp.mean(h, axis=(0, 1, 2), keepdims=True)
        v = jnp.mean((h - m) ** 2, axis=(0, 1, 2), keepdims=True)
        return ((h - m) * jax.lax.rsqrt(v + EPS) * g.reshape(1, 1, 1, -1)
                + b.reshape(1, 1, 1, -1))

    y = jnp.maximum(bn(conv(x, w1), g1, b1), 0.0)
    y = bn(conv(y, w2), g2, b2) + x
    y = jnp.maximum(y, 0.0)
    return jnp.transpose(y, (0, 3, 1, 2))


if __name__ == "__main__":
    key = jax.random.PRNGKey(0)
    kx, kp = jax.random.split(key)

    # batch=2, in=out channels=8 (identity shortcut), spatial 16x16 -> lane
    # width W*C = 128. NCHW input (PyTorch convention).
    N, C, H, W = 2, 8, 16, 16
    x = jax.random.normal(kx, (N, C, H, W), jnp.float32)
    params = init_params(kp, C, C)

    out = jax.block_until_ready(block_forward(x, *params))
    ref = jax.block_until_ready(reference_block(x, *params))

    assert out.shape == (N, C, H, W), out.shape
    assert bool(jnp.all(out >= 0.0)), "ReLU output must be non-negative"
    assert bool(jnp.all(jnp.isfinite(out))), "non-finite values in output"
    max_err = float(jnp.max(jnp.abs(out - ref)))
    # Loose tolerance: kernel feeds the MXU bf16 inputs (f32 accumulation).
    assert max_err < 0.2, f"kernel deviates from f32 reference: {max_err}"
    print("KERNEL_OK")
</pallas_src>

<mosaic_0001>
module attributes {stable_mosaic.version = 11 : i64} {
  func.func @block_kernel(%arg0: memref<32x128xf32, #tpu.memory_space<vmem>>, %arg1: memref<3x128x128xbf16, #tpu.memory_space<vmem>>, %arg2: memref<1x128xf32, #tpu.memory_space<vmem>>, %arg3: memref<1x128xf32, #tpu.memory_space<vmem>>, %arg4: memref<3x128x128xbf16, #tpu.memory_space<vmem>>, %arg5: memref<1x128xf32, #tpu.memory_space<vmem>>, %arg6: memref<1x128xf32, #tpu.memory_space<vmem>>, %arg7: memref<128x128xf32, #tpu.memory_space<vmem>>, %arg8: memref<32x128xf32, #tpu.memory_space<vmem>>) attributes {dimension_semantics = [], scalar_prefetch = 0 : i64, scratch_operands = 0 : i64, tpu.core_type = #tpu.core_type<tc>} {
    %0 = tpu.iota {dimensions = array<i32: 0>} : vector<32x1xi32>
    %c16_i32 = arith.constant 16 : i32
    %c0_i32 = arith.constant 0 : i32
    %1 = arith.cmpi eq, %c16_i32, %c0_i32 : i32
    %c1_i32 = arith.constant 1 : i32
    %2 = arith.select %1, %c1_i32, %c16_i32 : i32
    %3 = vector.broadcast %2 : i32 to vector<32x1xi32>
    %4 = arith.remsi %0, %3 : vector<32x1xi32>
    %c0_i32_0 = arith.constant 0 : i32
    %5 = vector.broadcast %c0_i32_0 : i32 to vector<32x1xi32>
    %6 = arith.cmpi ne, %4, %5 : vector<32x1xi32>
    %c0_i32_1 = arith.constant 0 : i32
    %7 = vector.broadcast %c0_i32_1 : i32 to vector<32x1xi32>
    %8 = arith.cmpi slt, %4, %7 : vector<32x1xi32>
    %c0_i32_2 = arith.constant 0 : i32
    %9 = arith.cmpi slt, %2, %c0_i32_2 : i32
    %10 = vector.broadcast %9 : i1 to vector<32x1xi1>
    %11 = vector.broadcast %10 : vector<32x1xi1> to vector<32x1xi1>
    %12 = arith.xori %8, %11 : vector<32x1xi1>
    %13 = arith.andi %12, %6 : vector<32x1xi1>
    %14 = vector.broadcast %2 : i32 to vector<32x1xi32>
    %15 = arith.addi %4, %14 : vector<32x1xi32>
    %16 = arith.select %13, %15, %4 : vector<32x1xi1>, vector<32x1xi32>
    %c0_i32_3 = arith.constant 0 : i32
    %17 = vector.broadcast %c0_i32_3 : i32 to vector<32x1xi32>
    %18 = arith.cmpi ne, %16, %17 : vector<32x1xi32>
    %19 = arith.extui %18 : vector<32x1xi1> to vector<32x1xi32>
    %20 = arith.sitofp %19 : vector<32x1xi32> to vector<32x1xf32>
    %c16_i32_4 = arith.constant 16 : i32
    %c0_i32_5 = arith.constant 0 : i32
    %21 = arith.cmpi eq, %c16_i32_4, %c0_i32_5 : i32
    %c1_i32_6 = arith.constant 1 : i32
    %22 = arith.select %21, %c1_i32_6, %c16_i32_4 : i32
    %23 = vector.broadcast %22 : i32 to vector<32x1xi32>
    %24 = arith.remsi %0, %23 : vector<32x1xi32>
    %c0_i32_7 = arith.constant 0 : i32
    %25 = vector.broadcast %c0_i32_7 : i32 to vector<32x1xi32>
    %26 = arith.cmpi ne, %24, %25 : vector<32x1xi32>
    %c0_i32_8 = arith.constant 0 : i32
    %27 = vector.broadcast %c0_i32_8 : i32 to vector<32x1xi32>
    %28 = arith.cmpi slt, %24, %27 : vector<32x1xi32>
    %c0_i32_9 = arith.constant 0 : i32
    %29 = arith.cmpi slt, %22, %c0_i32_9 : i32
    %30 = vector.broadcast %29 : i1 to vector<32x1xi1>
    %31 = vector.broadcast %30 : vector<32x1xi1> to vector<32x1xi1>
    %32 = arith.xori %28, %31 : vector<32x1xi1>
    %33 = arith.andi %32, %26 : vector<32x1xi1>
    %34 = vector.broadcast %22 : i32 to vector<32x1xi32>
    %35 = arith.addi %24, %34 : vector<32x1xi32>
    %36 = arith.select %33, %35, %24 : vector<32x1xi1>, vector<32x1xi32>
    %c15_i32 = arith.constant 15 : i32
    %37 = vector.broadcast %c15_i32 : i32 to vector<32x1xi32>
    %38 = arith.cmpi ne, %36, %37 : vector<32x1xi32>
    %39 = arith.extui %38 : vector<32x1xi1> to vector<32x1xi32>
    %40 = arith.sitofp %39 : vector<32x1xi32> to vector<32x1xf32>
    %c0 = arith.constant 0 : index
    %c0_10 = arith.constant 0 : index
    %41 = vector.load %arg7[%c0, %c0_10] : memref<128x128xf32, #tpu.memory_space<vmem>>, vector<128x128xf32>
    %c0_11 = arith.constant 0 : index
    %c0_12 = arith.constant 0 : index
    %42 = vector.load %arg0[%c0_11, %c0_12] : memref<32x128xf32, #tpu.memory_space<vmem>>, vector<32x128xf32>
    %cst = arith.constant 0.000000e+00 : f32
    %43 = vector.broadcast %cst : f32 to vector<1x128xf32>
    %44 = vector.extract_strided_slice %42 {offsets = [0, 0], sizes = [31, 128], strides = [1, 1]} : vector<32x128xf32> to vector<31x128xf32>
    %45 = tpu.concatenate %43, %44 in 0 : vector<1x128xf32>, vector<31x128xf32> -> vector<32x128xf32>
    %46 = vector.broadcast %20 : vector<32x1xf32> to vector<32x128xf32>
    %47 = arith.mulf %45, %46 : vector<32x128xf32>
    %48 = vector.extract_strided_slice %42 {offsets = [1, 0], sizes = [31, 128], strides = [1, 1]} : vector<32x128xf32> to vector<31x128xf32>
    %49 = tpu.concatenate %48, %43 in 0 : vector<31x128xf32>, vector<1x128xf32> -> vector<32x128xf32>
    %50 = vector.broadcast %40 : vector<32x1xf32> to vector<32x128xf32>
    %51 = arith.mulf %49, %50 : vector<32x128xf32>
    %52 = arith.truncf %47 : vector<32x128xf32> to vector<32x128xbf16>
    %c0_13 = arith.constant 0 : index
    %c0_14 = arith.constant 0 : index
    %c0_15 = arith.constant 0 : index
    %53 = vector.load %arg1[%c0_13, %c0_14, %c0_15] : memref<3x128x128xbf16, #tpu.memory_space<vmem>>, vector<1x128x128xbf16>
    %54 = vector.shape_cast %53 : vector<1x128x128xbf16> to vector<128x128xbf16>
    %cst_16 = arith.constant dense<0.000000e+00> : vector<32x128xf32>
    %55 = tpu.matmul %52, %54, %cst_16 {dimension_numbers = #tpu.dot_dimension_numbers<[1], [0], [0], [1], [0, 0, 1, 1], [], []>} : vector<32x128xbf16>, vector<128x128xbf16>, vector<32x128xf32> -> vector<32x128xf32>
    %56 = arith.truncf %42 : vector<32x128xf32> to vector<32x128xbf16>
    %c1 = arith.constant 1 : index
    %c0_17 = arith.constant 0 : index
    %c0_18 = arith.constant 0 : index
    %57 = vector.load %arg1[%c1, %c0_17, %c0_18] : memref<3x128x128xbf16, #tpu.memory_space<vmem>>, vector<1x128x128xbf16>
    %58 = vector.shape_cast %57 : vector<1x128x128xbf16> to vector<128x128xbf16>
    %cst_19 = arith.constant dense<0.000000e+00> : vector<32x128xf32>
    %59 = tpu.matmul %56, %58, %cst_19 {dimension_numbers = #tpu.dot_dimension_numbers<[1], [0], [0], [1], [0, 0, 1, 1], [], []>} : vector<32x128xbf16>, vector<128x128xbf16>, vector<32x128xf32> -> vector<32x128xf32>
    %60 = arith.addf %55, %59 : vector<32x128xf32>
    %61 = arith.truncf %51 : vector<32x128xf32> to vector<32x128xbf16>
    %c2 = arith.constant 2 : index
    %c0_20 = arith.constant 0 : index
    %c0_21 = arith.constant 0 : index
    %62 = vector.load %arg1[%c2, %c0_20, %c0_21] : memref<3x128x128xbf16, #tpu.memory_space<vmem>>, vector<1x128x128xbf16>
    %63 = vector.shape_cast %62 : vector<1x128x128xbf16> to vector<128x128xbf16>
    %cst_22 = arith.constant dense<0.000000e+00> : vector<32x128xf32>
    %64 = tpu.matmul %61, %63, %cst_22 {dimension_numbers = #tpu.dot_dimension_numbers<[1], [0], [0], [1], [0, 0, 1, 1], [], []>} : vector<32x128xbf16>, vector<128x128xbf16>, vector<32x128xf32> -> vector<32x128xf32>
    %65 = arith.addf %60, %64 : vector<32x128xf32>
    %66 = vector.shape_cast %65 : vector<32x128xf32> to vector<4x8x128xf32>
    %cst_23 = arith.constant dense<0.000000e+00> : vector<8x128xf32>
    %67 = vector.multi_reduction <add>, %66, %cst_23 [0] : vector<4x8x128xf32> to vector<8x128xf32>
    %cst_24 = arith.constant dense<0.000000e+00> : vector<8x128xf32>
    %68 = tpu.matmul %67, %41, %cst_24 {dimension_numbers = #tpu.dot_dimension_numbers<[1], [0], [0], [1], [0, 0, 1, 1], [], []>} : vector<8x128xf32>, vector<128x128xf32>, vector<8x128xf32> -> vector<8x128xf32>
    %cst_25 = arith.constant dense<0.000000e+00> : vector<128xf32>
    %69 = vector.multi_reduction <add>, %68, %cst_25 [0] : vector<8x128xf32> to vector<128xf32>
    %70 = vector.shape_cast %69 : vector<128xf32> to vector<1x128xf32>
    %cst_26 = arith.constant 0.001953125 : f32
    %71 = vector.broadcast %cst_26 : f32 to vector<1x128xf32>
    %72 = arith.mulf %70, %71 : vector<1x128xf32>
    %73 = vector.broadcast %72 : vector<1x128xf32> to vector<32x128xf32>
    %74 = arith.subf %65, %73 : vector<32x128xf32>
    %75 = arith.mulf %74, %74 : vector<32x128xf32>
    %76 = vector.shape_cast %75 : vector<32x128xf32> to vector<4x8x128xf32>
    %cst_27 = arith.constant dense<0.000000e+00> : vector<8x128xf32>
    %77 = vector.multi_reduction <add>, %76, %cst_27 [0] : vector<4x8x128xf32> to vector<8x128xf32>
    %cst_28 = arith.constant dense<0.000000e+00> : vector<8x128xf32>
    %78 = tpu.matmul %77, %41, %cst_28 {dimension_numbers = #tpu.dot_dimension_numbers<[1], [0], [0], [1], [0, 0, 1, 1], [], []>} : vector<8x128xf32>, vector<128x128xf32>, vector<8x128xf32> -> vector<8x128xf32>
    %cst_29 = arith.constant dense<0.000000e+00> : vector<128xf32>
    %79 = vector.multi_reduction <add>, %78, %cst_29 [0] : vector<8x128xf32> to vector<128xf32>
    %80 = vector.shape_cast %79 : vector<128xf32> to vector<1x128xf32>
    %cst_30 = arith.constant 0.001953125 : f32
    %81 = vector.broadcast %cst_30 : f32 to vector<1x128xf32>
    %82 = arith.mulf %80, %81 : vector<1x128xf32>
    %cst_31 = arith.constant 9.99999974E-6 : f32
    %83 = vector.broadcast %cst_31 : f32 to vector<1x128xf32>
    %84 = arith.addf %82, %83 : vector<1x128xf32>
    %85 = math.rsqrt %84 : vector<1x128xf32>
    %c0_32 = arith.constant 0 : index
    %c0_33 = arith.constant 0 : index
    %86 = vector.load %arg2[%c0_32, %c0_33] : memref<1x128xf32, #tpu.memory_space<vmem>>, vector<1x128xf32>
    %87 = arith.mulf %85, %86 : vector<1x128xf32>
    %88 = vector.broadcast %87 : vector<1x128xf32> to vector<32x128xf32>
    %89 = arith.mulf %74, %88 : vector<32x128xf32>
    %c0_34 = arith.constant 0 : index
    %c0_35 = arith.constant 0 : index
    %90 = vector.load %arg3[%c0_34, %c0_35] : memref<1x128xf32, #tpu.memory_space<vmem>>, vector<1x128xf32>
    %91 = vector.broadcast %90 : vector<1x128xf32> to vector<32x128xf32>
    %92 = arith.addf %89, %91 : vector<32x128xf32>
    %cst_36 = arith.constant 0.000000e+00 : f32
    %93 = vector.broadcast %cst_36 : f32 to vector<32x128xf32>
    %94 = arith.maximumf %92, %93 : vector<32x128xf32>
    %cst_37 = arith.constant 0.000000e+00 : f32
    %95 = vector.broadcast %cst_37 : f32 to vector<1x128xf32>
    %96 = vector.extract_strided_slice %94 {offsets = [0, 0], sizes = [31, 128], strides = [1, 1]} : vector<32x128xf32> to vector<31x128xf32>
    %97 = tpu.concatenate %95, %96 in 0 : vector<1x128xf32>, vector<31x128xf32> -> vector<32x128xf32>
    %98 = vector.broadcast %20 : vector<32x1xf32> to vector<32x128xf32>
    %99 = arith.mulf %97, %98 : vector<32x128xf32>
    %100 = vector.extract_strided_slice %94 {offsets = [1, 0], sizes = [31, 128], strides = [1, 1]} : vector<32x128xf32> to vector<31x128xf32>
    %101 = tpu.concatenate %100, %95 in 0 : vector<31x128xf32>, vector<1x128xf32> -> vector<32x128xf32>
    %102 = vector.broadcast %40 : vector<32x1xf32> to vector<32x128xf32>
    %103 = arith.mulf %101, %102 : vector<32x128xf32>
    %104 = arith.truncf %99 : vector<32x128xf32> to vector<32x128xbf16>
    %c0_38 = arith.constant 0 : index
    %c0_39 = arith.constant 0 : index
    %c0_40 = arith.constant 0 : index
    %105 = vector.load %arg4[%c0_38, %c0_39, %c0_40] : memref<3x128x128xbf16, #tpu.memory_space<vmem>>, vector<1x128x128xbf16>
    %106 = vector.shape_cast %105 : vector<1x128x128xbf16> to vector<128x128xbf16>
    %cst_41 = arith.constant dense<0.000000e+00> : vector<32x128xf32>
    %107 = tpu.matmul %104, %106, %cst_41 {dimension_numbers = #tpu.dot_dimension_numbers<[1], [0], [0], [1], [0, 0, 1, 1], [], []>} : vector<32x128xbf16>, vector<128x128xbf16>, vector<32x128xf32> -> vector<32x128xf32>
    %108 = arith.truncf %94 : vector<32x128xf32> to vector<32x128xbf16>
    %c1_42 = arith.constant 1 : index
    %c0_43 = arith.constant 0 : index
    %c0_44 = arith.constant 0 : index
    %109 = vector.load %arg4[%c1_42, %c0_43, %c0_44] : memref<3x128x128xbf16, #tpu.memory_space<vmem>>, vector<1x128x128xbf16>
    %110 = vector.shape_cast %109 : vector<1x128x128xbf16> to vector<128x128xbf16>
    %cst_45 = arith.constant dense<0.000000e+00> : vector<32x128xf32>
    %111 = tpu.matmul %108, %110, %cst_45 {dimension_numbers = #tpu.dot_dimension_numbers<[1], [0], [0], [1], [0, 0, 1, 1], [], []>} : vector<32x128xbf16>, vector<128x128xbf16>, vector<32x128xf32> -> vector<32x128xf32>
    %112 = arith.addf %107, %111 : vector<32x128xf32>
    %113 = arith.truncf %103 : vector<32x128xf32> to vector<32x128xbf16>
    %c2_46 = arith.constant 2 : index
    %c0_47 = arith.constant 0 : index
    %c0_48 = arith.constant 0 : index
    %114 = vector.load %arg4[%c2_46, %c0_47, %c0_48] : memref<3x128x128xbf16, #tpu.memory_space<vmem>>, vector<1x128x128xbf16>
    %115 = vector.shape_cast %114 : vector<1x128x128xbf16> to vector<128x128xbf16>
    %cst_49 = arith.constant dense<0.000000e+00> : vector<32x128xf32>
    %116 = tpu.matmul %113, %115, %cst_49 {dimension_numbers = #tpu.dot_dimension_numbers<[1], [0], [0], [1], [0, 0, 1, 1], [], []>} : vector<32x128xbf16>, vector<128x128xbf16>, vector<32x128xf32> -> vector<32x128xf32>
    %117 = arith.addf %112, %116 : vector<32x128xf32>
    %118 = vector.shape_cast %117 : vector<32x128xf32> to vector<4x8x128xf32>
    %cst_50 = arith.constant dense<0.000000e+00> : vector<8x128xf32>
    %119 = vector.multi_reduction <add>, %118, %cst_50 [0] : vector<4x8x128xf32> to vector<8x128xf32>
    %cst_51 = arith.constant dense<0.000000e+00> : vector<8x128xf32>
    %120 = tpu.matmul %119, %41, %cst_51 {dimension_numbers = #tpu.dot_dimension_numbers<[1], [0], [0], [1], [0, 0, 1, 1], [], []>} : vector<8x128xf32>, vector<128x128xf32>, vector<8x128xf32> -> vector<8x128xf32>
    %cst_52 = arith.constant dense<0.000000e+00> : vector<128xf32>
    %121 = vector.multi_reduction <add>, %120, %cst_52 [0] : vector<8x128xf32> to vector<128xf32>
    %122 = vector.shape_cast %121 : vector<128xf32> to vector<1x128xf32>
    %cst_53 = arith.constant 0.001953125 : f32
    %123 = vector.broadcast %cst_53 : f32 to vector<1x128xf32>
    %124 = arith.mulf %122, %123 : vector<1x128xf32>
    %125 = vector.broadcast %124 : vector<1x128xf32> to vector<32x128xf32>
    %126 = arith.subf %117, %125 : vector<32x128xf32>
    %127 = arith.mulf %126, %126 : vector<32x128xf32>
    %128 = vector.shape_cast %127 : vector<32x128xf32> to vector<4x8x128xf32>
    %cst_54 = arith.constant dense<0.000000e+00> : vector<8x128xf32>
    %129 = vector.multi_reduction <add>, %128, %cst_54 [0] : vector<4x8x128xf32> to vector<8x128xf32>
    %cst_55 = arith.constant dense<0.000000e+00> : vector<8x128xf32>
    %130 = tpu.matmul %129, %41, %cst_55 {dimension_numbers = #tpu.dot_dimension_numbers<[1], [0], [0], [1], [0, 0, 1, 1], [], []>} : vector<8x128xf32>, vector<128x128xf32>, vector<8x128xf32> -> vector<8x128xf32>
    %cst_56 = arith.constant dense<0.000000e+00> : vector<128xf32>
    %131 = vector.multi_reduction <add>, %130, %cst_56 [0] : vector<8x128xf32> to vector<128xf32>
    %132 = vector.shape_cast %131 : vector<128xf32> to vector<1x128xf32>
    %cst_57 = arith.constant 0.001953125 : f32
    %133 = vector.broadcast %cst_57 : f32 to vector<1x128xf32>
    %134 = arith.mulf %132, %133 : vector<1x128xf32>
    %cst_58 = arith.constant 9.99999974E-6 : f32
    %135 = vector.broadcast %cst_58 : f32 to vector<1x128xf32>
    %136 = arith.addf %134, %135 : vector<1x128xf32>
    %137 = math.rsqrt %136 : vector<1x128xf32>
    %c0_59 = arith.constant 0 : index
    %c0_60 = arith.constant 0 : index
    %138 = vector.load %arg5[%c0_59, %c0_60] : memref<1x128xf32, #tpu.memory_space<vmem>>, vector<1x128xf32>
    %139 = arith.mulf %137, %138 : vector<1x128xf32>
    %140 = vector.broadcast %139 : vector<1x128xf32> to vector<32x128xf32>
    %141 = arith.mulf %126, %140 : vector<32x128xf32>
    %c0_61 = arith.constant 0 : index
    %c0_62 = arith.constant 0 : index
    %142 = vector.load %arg6[%c0_61, %c0_62] : memref<1x128xf32, #tpu.memory_space<vmem>>, vector<1x128xf32>
    %143 = vector.broadcast %142 : vector<1x128xf32> to vector<32x128xf32>
    %144 = arith.addf %141, %143 : vector<32x128xf32>
    %c0_63 = arith.constant 0 : index
    %c0_64 = arith.constant 0 : index
    %145 = vector.load %arg0[%c0_63, %c0_64] : memref<32x128xf32, #tpu.memory_space<vmem>>, vector<32x128xf32>
    %146 = arith.addf %144, %145 : vector<32x128xf32>
    %cst_65 = arith.constant 0.000000e+00 : f32
    %147 = vector.broadcast %cst_65 : f32 to vector<32x128xf32>
    %148 = arith.maximumf %146, %147 : vector<32x128xf32>
    %c0_66 = arith.constant 0 : index
    %c0_67 = arith.constant 0 : index
    %149 = vector.load %arg8[%c0_66, %c0_67] : memref<32x128xf32, #tpu.memory_space<vmem>>, vector<32x128xf32>
    tpu.vector_store %arg8[%c0_66, %c0_67], %148 {strides = array<i32>} : memref<32x128xf32, #tpu.memory_space<vmem>>, vector<32x128xf32>,
    return
  }
}

</mosaic_0001>

<bundles_post_ra>
// kernel: block_forward.1
= control target key start
LH: loop header
LB: loop body
LE: loop exit
PB: predicated region body
PF: predicated region fallthrough
CT: control target
= control target key end

     0   :  { %v1978_v2 = vmov 0.0|0.0   ;;  %v30_v5 = vlaneseq  ;;  %vm131_vm1 = vcmask 1040384   ;;  %v1979_v16 = vmov 0.0   ;;  %s2427_s1 = inlined_call_operand.vmem [shape: bf16[3,128,128], index: 1, kind: input, shape index: {}]   ;;  %s2428_s0 = inlined_call_operand.vmem [shape: f32[32,128], index: 0, kind: input, shape index: {}]   ;;  %s2429_s7 = inlined_call_operand.vmem [shape: f32[128,128], index: 7, kind: input, shape index: {}]   ;;  %s2430_s4 = inlined_call_operand.vmem [shape: bf16[3,128,128], index: 4, kind: input, shape index: {}]   ;;  %s2431_s2 = inlined_call_operand.vmem [shape: f32[1,128], index: 2, kind: input, shape index: {}]   ;;  %s2432_s3 = inlined_call_operand.vmem [shape: f32[1,128], index: 3, kind: input, shape index: {}]   ;;  %s2433_s5 = inlined_call_operand.vmem [shape: f32[1,128], index: 5, kind: input, shape index: {}]   ;;  %s2434_s6 = inlined_call_operand.vmem [shape: f32[1,128], index: 6, kind: input, shape index: {}]   ;;  %s2435_s8 = inlined_call_operand.vmem [shape: f32[32,128], index: 8, kind: output, shape index: {}]  }
   0x1   :  { %v1926_v0 = vld [vmem:[%s2427_s1 + $0x40] sm:$0xff]   ;;  %v1927_v1 = vld [vmem:[%s2427_s1 + $0x48] sm:$0xff]   ;;  %1811 = vmatprep.subr.bf16.mxu1 %v1978_v2  ;;  %v1928_v3 = vld [vmem:[%s2427_s1 + $0x50] sm:$0xff]   ;;  %vm148_vm4 = vcmask 1046528   ;;  %vm1980_vm6 = vmmov 0  }
   0x2   :  { %1551 = vmatprep.subr.bf16.mxu0 %v1926_v0  ;;  %v1929_v4 = vld [vmem:[%s2427_s1 + $0x58] sm:$0xff]   ;;  %v2042_v6 = vld [vmem:[%s2428_s0] sm:$0xff]  ;;  %v2047_v7 = vld [vmem:[%s2428_s0 + $0x8] sm:$0xff]  ;;  %v2054_v10 = vshrl.u32 %v30_v5, 7  ;;  %1643 = vmatprep.mubr.msk.f32.mxu1 %vm1980_vm6, %v1979_v16 }
   0x3   :  { %1552 = vmatpush3.bf16.msra.mxu0 %v1926_v0  ;;  %v183_v8 = vpack.c.bf16 %v2047_v7, %v2042_v6  ;;  %v1930_v9 = vld [vmem:[%s2427_s1 + $0x60] sm:$0xff]   ;;  %v1931_v12 = vld [vmem:[%s2427_s1 + $0x68] sm:$0xff]   ;;  %v1932_v13 = vld [vmem:[%s2427_s1 + $0x70] sm:$0xff]   ;;  %v132_v14 = vrot.slane %v2042_v6, 7  ;;  %v133_v18 = vrot.slane %v2047_v7, 7  ;;  %v150_v55 = vrot.slane %v2047_v7, 1 }
   0x4   :  { %1553 = vmatprep.subr.bf16.mxu0 %v1927_v1  ;;  %v39_v11 = vand.u32 15, %v2054_v10  ;;  %v1933_v15 = vld [vmem:[%s2427_s1 + $0x78] sm:$0xff]   ;;  %v2075_v20 = vld [vmem:[%s2428_s0 + $0x10] sm:$0xff]  ;;  %v107_v21 = vld [vmem:[%s2429_s7] sm:$0xff]  ;;  %v33_v48 = vadd.s32 16, %v2054_v10  ;;  %v32_v49 = vadd.s32 8, %v2054_v10 }
   0x5   :  { %1567 = vmatprep.mubr.bf16.mxu0 %v183_v8  ;;  %v143_v19 = vsel %vm131_vm1, 0.0, %v132_v14  ;;  %v108_v22 = vld [vmem:[%s2429_s7 + $0x8] sm:$0xff]  ;;  %v2086_v23 = vld [vmem:[%s2428_s0 + $0x18] sm:$0xff]  ;;  %v109_v26 = vld [vmem:[%s2429_s7 + $0x10] sm:$0xff]  ;;  %v134_v29 = vsel %vm131_vm1, %v132_v14, %v133_v18  ;;  %v135_v54 = vrot.slane %v2075_v20, 7  ;;  %v152_v57 = vrot.slane %v2075_v20, 1 }
   0x6   :  { %vm83_vm0 = vcmp.ne.s32.totalorder %v39_v11, 0  ;;  %v2089_v25 = vpack.c.bf16 %v108_v22, %v107_v21  ;;  %v110_v27 = vld [vmem:[%s2429_s7 + $0x18] sm:$0xff]  ;;  %v1934_v28 = vld [vmem:[%s2427_s1] sm:$0xff]   ;;  %v184_v31 = vpack.c.bf16 %v2086_v23, %v2075_v20  ;;  %v112_v33 = vld [vmem:[%s2429_s7 + $0x28] sm:$0xff]  ;;  %v53_v52 = vand.u32 15, %v33_v48 }
   0x7   :  { %1554 = vmatpush3.bf16.msra.mxu0 %v1927_v1  ;;  %v2068_v17 = vsel %vm83_vm0, 1.0, %v1979_v16  ;;  %v2104_v30 = vpack.c.bf16 %v110_v27, %v109_v26  ;;  %v111_v32 = vld [vmem:[%s2429_s7 + $0x20] sm:$0xff]  ;;  %v1935_v35 = vld [vmem:[%s2427_s1 + $0x8] sm:$0xff]   ;;  %v113_v37 = vld [vmem:[%s2429_s7 + $0x30] sm:$0xff]  ;;  %v46_v53 = vand.u32 15, %v32_v49  ;;  %v137_v58 = vrot.slane %v2086_v23, 7 }
   0x8   :  { %1555 = vmatprep.subr.bf16.mxu0 %v1928_v3  ;;  %v144_v24 = vmul.f32 %v2068_v17, %v143_v19  ;;  %1813 = vmatpush3.bf16.msra.mxu1 %v2089_v25  ;;  %v2119_v36 = vpack.c.bf16 %v112_v33, %v111_v32  ;;  %v114_v38 = vld [vmem:[%s2429_s7 + $0x38] sm:$0xff]  ;;  %v1936_v39 = vld [vmem:[%s2427_s1 + $0x10] sm:$0xff]   ;;  %v115_v41 = vld [vmem:[%s2429_s7 + $0x40] sm:$0xff]  ;;  %vm85_vm2 = vcmp.ne.s32.totalorder %v53_v52, 0  ;;  %v136_v60 = vsel %vm131_vm1, %v133_v18, %v135_v54 }
   0x9   :  { %1814 = vmatprep.subr.bf16.mxu1 %v1978_v2  ;;  %v2132_v40 = vpack.c.bf16 %v114_v38, %v113_v37  ;;  %v116_v42 = vld [vmem:[%s2429_s7 + $0x48] sm:$0xff]  ;;  %v1937_v43 = vld [vmem:[%s2427_s1 + $0x18] sm:$0xff]   ;;  %v117_v45 = vld [vmem:[%s2429_s7 + $0x50] sm:$0xff]  ;;  %vm96_vm3 = vcmp.ne.s32.totalorder %v46_v53, 15  ;;  %v2176_v59 = vsel %vm85_vm2, 1.0, %v1979_v16  ;;  %v149_v61 = vrot.slane %v2042_v6, 1 }
   0xa   :  { %v165_v34 = vpack.c.bf16 %v134_v29, %v144_v24  ;;  %v2145_v44 = vpack.c.bf16 %v116_v42, %v115_v41  ;;  %v118_v46 = vld [vmem:[%s2429_s7 + $0x58] sm:$0xff]  ;;  %v1938_v47 = vld [vmem:[%s2427_s1 + $0x20] sm:$0xff]   ;;  %v1939_v51 = vld [vmem:[%s2427_s1 + $0x28] sm:$0xff]   ;;  %v2186_v63 = vsel %vm96_vm3, 1.0, %v1979_v16  ;;  %v153_v0 = vsel %vm148_vm4, %v150_v55, %v152_v57 }
   0xb   :  { %1556 = vmatpush3.bf16.msra.mxu0 %v1928_v3  ;;  %v2160_v50 = vpack.c.bf16 %v118_v46, %v117_v45  ;;  %v1940_v56 = vld [vmem:[%s2427_s1 + $0x30] sm:$0xff]   ;;  %v1941_v62 = vld [vmem:[%s2427_s1 + $0x38] sm:$0xff]   ;;  %v146_v1 = vmul.f32 %v2176_v59, %v136_v60  ;;  %v138_v3 = vsel %vm131_vm1, %v135_v54, %v137_v58  ;;  %v1942_v5 = vld [vmem:[%s2427_s1 + $0x80] sm:$0xff]   ;;  %v151_v8 = vsel %vm148_vm4, %v149_v61, %v150_v55 }
   0xc   :  { %1557 = vmatprep.subr.bf16.mxu0 %v1929_v4  ;;  %1816 = vmatpush3.bf16.msra.mxu1 %v2104_v30  ;;  %v1945_v14 = vld [vmem:[%s2427_s1 + $0x98] sm:$0xff]   ;;  %v34_v18 = vadd.s32 24, %v2054_v10  ;;  %v1947_v19 = vld [vmem:[%s2427_s1 + $0xa8] sm:$0xff]   ;;  %v154_v22 = vrot.slane %v2086_v23, 1  ;;  %v1948_v24 = vld [vmem:[%s2427_s1 + $0xb0] sm:$0xff]  }
   0xd   :  { %1817 = vmatprep.subr.bf16.mxu1 %v1978_v2  ;;  %v119_v33 = vld [vmem:[%s2429_s7 + $0x60] sm:$0xff]  ;;  %v121_v37 = vld [vmem:[%s2429_s7 + $0x70] sm:$0xff]  ;;  %v122_v38 = vld [vmem:[%s2429_s7 + $0x78] sm:$0xff] }
   0xe   :  { %v60_v21 = vand.u32 15, %v34_v18  ;;  %v160_v27 = vsel %vm148_vm4, %v154_v22, 0.0  ;;  %v1954_v18 = vld [vmem:[%s2430_s4 + $0x60] sm:$0xff]  }
   0xf   :  { %1558 = vmatpush3.bf16.msra.mxu0 %v1929_v4  ;;  %v162_v4 = vmul.f32 %v2186_v63, %v153_v0 }
  0x10   :  { %1559 = vmatprep.subr.bf16.mxu0 %v1930_v9  ;;  %1819 = vmatpush3.bf16.msra.mxu1 %v2119_v36  ;;  %vm98_vm5 = vcmp.ne.s32.totalorder %v60_v21, 15  ;;  %v1956_v21 = vld [vmem:[%s2430_s4 + $0x70] sm:$0xff]  }
  0x11   :  { %1820 = vmatprep.subr.bf16.mxu1 %v1978_v2  ;;  %v396_v11 = vpack.c.bf16 %v162_v4, %v151_v8  ;;  %v2217_v26 = vsel %vm98_vm5, 1.0, %v1979_v16 }
  0x12   :  { %v164_v29 = vmul.f32 %v2217_v26, %v160_v27 }
  0x13   :  { %1560 = vmatpush3.bf16.msra.mxu0 %v1930_v9  ;;  %v166_v9 = vpack.c.bf16 %v138_v3, %v146_v1 }
  0x14   :  { %1561 = vmatprep.subr.bf16.mxu0 %v1931_v12  ;;  %1822 = vmatpush3.bf16.msra.mxu1 %v2132_v40 }
  0x15   :  { %1823 = vmatprep.subr.bf16.mxu1 %v1978_v2 }
  0x17   :  { %1562 = vmatpush3.bf16.msra.mxu0 %v1931_v12  ;;  %v1943_v12 = vld [vmem:[%s2427_s1 + $0x88] sm:$0xff]  }
  0x18   :  { %1563 = vmatprep.subr.bf16.mxu0 %v1932_v13  ;;  %1825 = vmatpush3.bf16.msra.mxu1 %v2145_v44 }
  0x19   :  { %1826 = vmatprep.subr.bf16.mxu1 %v1978_v2 }
  0x1b   :  { %1564 = vmatpush3.bf16.msra.mxu0 %v1932_v13  ;;  %v1944_v13 = vld [vmem:[%s2427_s1 + $0x90] sm:$0xff]  }
  0x1c   :  { %1565 = vmatprep.subr.bf16.mxu0 %v1933_v15  ;;  %1828 = vmatpush3.bf16.msra.mxu1 %v2160_v50 }
  0x1d   :  { %1829 = vmatprep.subr.bf16.mxu1 %v1978_v2 }
  0x1f   :  { %1566 = vmatpush3.bf16.msra.mxu0 %v1933_v15  ;;  %v1946_v15 = vld [vmem:[%s2427_s1 + $0xa0] sm:$0xff]  }
  0x20   :  { %1571 = vmatprep.subr.bf16.mxu0 %v1934_v28 }
  0x22   :  { %1568 = vmatmul.mubr.bf16.vlgmr.msra.gmra.mrb[0].mxu0 %v184_v31  ;;  %v155_v31 = vsel %vm148_vm4, %v152_v57, %v154_v22  ;;  %v1957_v22 = vld [vmem:[%s2430_s4 + $0x78] sm:$0xff]  }
  0x23   :  { %1572 = vmatpush3.bf16.msra.mxu0 %v1934_v28  ;;  %1587 = vmatprep.mubr.bf16.mxu0 %v165_v34  ;;  %v1949_v28 = vld [vmem:[%s2427_s1 + $0xb8] sm:$0xff]   ;;  %v397_v32 = vpack.c.bf16 %v164_v29, %v155_v31  ;;  %v120_v34 = vld [vmem:[%s2429_s7 + $0x68] sm:$0xff] }
  0x24   :  { %1573 = vmatprep.subr.bf16.mxu0 %v1935_v35 }
  0x27   :  { %1574 = vmatpush3.bf16.msra.mxu0 %v1935_v35  ;;  %v2244_v35 = vpack.c.bf16 %v120_v34, %v119_v33 }
  0x28   :  { %1575 = vmatprep.subr.bf16.mxu0 %v1936_v39 }
  0x29   :  { %1831 = vmatpush3.bf16.msra.mxu1 %v2244_v35 }
  0x2a   :  { %1832 = vmatprep.subr.bf16.mxu1 %v1978_v2 }
  0x2b   :  { %1576 = vmatpush3.bf16.msra.mxu0 %v1936_v39  ;;  %v2256_v39 = vpack.c.bf16 %v122_v38, %v121_v37 }
  0x2c   :  { %1577 = vmatprep.subr.bf16.mxu0 %v1937_v43 }
  0x2d   :  { %1834 = vmatpush3.bf16.msra.mxu1 %v2256_v39 }
  0x2e   :  { %1835 = vmatprep.subr.bf16.mxu1 %v1978_v2 }
  0x2f   :  { %1578 = vmatpush3.bf16.msra.mxu0 %v1937_v43 }
  0x30   :  { %1579 = vmatprep.subr.bf16.mxu0 %v1938_v47 }
  0x33   :  { %1580 = vmatpush3.bf16.msra.mxu0 %v1938_v47 }
  0x34   :  { %1581 = vmatprep.subr.bf16.mxu0 %v1939_v51 }
  0x37   :  { %1582 = vmatpush3.bf16.msra.mxu0 %v1939_v51 }
  0x38   :  { %1583 = vmatprep.subr.bf16.mxu0 %v1940_v56 }
  0x3b   :  { %1584 = vmatpush3.bf16.msra.mxu0 %v1940_v56 }
  0x3c   :  { %1585 = vmatprep.subr.bf16.mxu0 %v1941_v62 }
  0x3f   :  { %1586 = vmatpush3.bf16.msra.mxu0 %v1941_v62 }
  0x40   :  { %1591 = vmatprep.subr.bf16.mxu0 %v1942_v5 }
  0x42   :  { %1588 = vmatmul.mubr.bf16.vlgmr.msra.gmra.mrb[0].mxu0 %v166_v9 }
  0x43   :  { %1592 = vmatpush3.bf16.msra.mxu0 %v1942_v5  ;;  %1607 = vmatprep.mubr.bf16.mxu0 %v396_v11 }
  0x44   :  { %1593 = vmatprep.subr.bf16.mxu0 %v1943_v12 }
  0x47   :  { %1594 = vmatpush3.bf16.msra.mxu0 %v1943_v12  ;;  %v1950_v12 = vld [vmem:[%s2430_s4 + $0x40] sm:$0xff]  }
  0x48   :  { %1595 = vmatprep.subr.bf16.mxu0 %v1944_v13 }
  0x4b   :  { %1596 = vmatpush3.bf16.msra.mxu0 %v1944_v13  ;;  %v1951_v13 = vld [vmem:[%s2430_s4 + $0x48] sm:$0xff]  }
  0x4c   :  { %1597 = vmatprep.subr.bf16.mxu0 %v1945_v14 }
  0x4f   :  { %1598 = vmatpush3.bf16.msra.mxu0 %v1945_v14  ;;  %v1952_v14 = vld [vmem:[%s2430_s4 + $0x50] sm:$0xff]  }
  0x50   :  { %1599 = vmatprep.subr.bf16.mxu0 %v1946_v15 }
  0x53   :  { %1600 = vmatpush3.bf16.msra.mxu0 %v1946_v15  ;;  %v1953_v15 = vld [vmem:[%s2430_s4 + $0x58] sm:$0xff]  }
  0x54   :  { %1601 = vmatprep.subr.bf16.mxu0 %v1947_v19 }
  0x57   :  { %1602 = vmatpush3.bf16.msra.mxu0 %v1947_v19  ;;  %v1955_v19 = vld [vmem:[%s2430_s4 + $0x68] sm:$0xff]  }
  0x58   :  { %1603 = vmatprep.subr.bf16.mxu0 %v1948_v24 }
  0x5b   :  { %1604 = vmatpush3.bf16.msra.mxu0 %v1948_v24  ;;  %v1958_v24 = vld [vmem:[%s2430_s4] sm:$0xff]  }
  0x5c   :  { %1605 = vmatprep.subr.bf16.mxu0 %v1949_v28 }
  0x5f   :  { %1606 = vmatpush3.bf16.msra.mxu0 %v1949_v28 }
  0x60   :  { %1859 = vmatprep.subr.bf16.mxu0 %v1978_v2 }
  0x62   :  { %1608 = vmatmul.mubr.bf16.vlgmr.msra.gmra.mrb[0].mxu0 %v397_v32 }
  0x63   :  { %1861 = vmatpush3.bf16.msra.mxu0 %v2089_v25  ;;  %1773 = vmatprep.mubr.msk.f32.mxu0 %vm1980_vm6, %v1979_v16 }
  0x64   :  { %1862 = vmatprep.subr.bf16.mxu0 %v1978_v2 }
  0x67   :  { %1864 = vmatpush3.bf16.msra.mxu0 %v2104_v30 }
  0x68   :  { %1865 = vmatprep.subr.bf16.mxu0 %v1978_v2 }
  0x6b   :  { %1867 = vmatpush3.bf16.msra.mxu0 %v2119_v36 }
  0x6c   :  { %1868 = vmatprep.subr.bf16.mxu0 %v1978_v2 }
  0x6f   :  { %1870 = vmatpush3.bf16.msra.mxu0 %v2132_v40 }
  0x70   :  { %1871 = vmatprep.subr.bf16.mxu0 %v1978_v2 }
  0x73   :  { %1873 = vmatpush3.bf16.msra.mxu0 %v2145_v44 }
  0x74   :  { %1874 = vmatprep.subr.bf16.mxu0 %v1978_v2 }
  0x77   :  { %1876 = vmatpush3.bf16.msra.mxu0 %v2160_v50 }
  0x78   :  { %1877 = vmatprep.subr.bf16.mxu0 %v1978_v2 }
  0x7b   :  { %1879 = vmatpush3.bf16.msra.mxu0 %v2244_v35 }
  0x7c   :  { %1880 = vmatprep.subr.bf16.mxu0 %v1978_v2 }
  0x7f   :  { %1882 = vmatpush3.bf16.msra.mxu0 %v2256_v39 }
  0x80   :  { %1883 = vmatprep.subr.bf16.mxu0 %v1978_v2 }
 0x135   :  { %v1609_v41 = vpop.f32.mrb[0].mxu0 }
 0x136   :  { %v497_v42 = vpop.f32.mrb[1].mxu0 }
 0x137   :  { %v1610_v43 = vpop.f32.mrb[2].mxu0 }
 0x138   :  { %v500_v45 = vpop.f32.mrb[3].mxu0 }
 0x139   :  { %v516_v46 = vadd.f32 %v500_v45, %v497_v42 }
 0x13b   :  { %v517_v47 = vadd.f32 %v1609_v41, %v516_v46 }
 0x13d   :  { %v518_v48 = vadd.f32 %v1610_v43, %v517_v47 }
 0x13f   :  { %1644 = vmatmul.mubr.f32.vlgmr.msra.gmra.mrb[0].mxu1 %v518_v48  ;;  %v1365_v48 = vld [vmem:[%s2432_s3] ss:$0 sm:$0xff] }
 0x140   :  { %1837 = vmatpush3.bf16.msra.mxu1 %v2089_v25  ;;  %1678 = vmatprep.mubr.msk.f32.mxu1 %vm1980_vm6, %v1979_v16 }
 0x141   :  { %1838 = vmatprep.subr.bf16.mxu1 %v1978_v2 }
 0x144   :  { %1840 = vmatpush3.bf16.msra.mxu1 %v2104_v30 }
 0x145   :  { %1841 = vmatprep.subr.bf16.mxu1 %v1978_v2 }
 0x148   :  { %1843 = vmatpush3.bf16.msra.mxu1 %v2119_v36 }
 0x149   :  { %1844 = vmatprep.subr.bf16.mxu1 %v1978_v2 }
 0x14c   :  { %1846 = vmatpush3.bf16.msra.mxu1 %v2132_v40 }
 0x14d   :  { %1847 = vmatprep.subr.bf16.mxu1 %v1978_v2 }
 0x150   :  { %1849 = vmatpush3.bf16.msra.mxu1 %v2145_v44 }
 0x151   :  { %1850 = vmatprep.subr.bf16.mxu1 %v1978_v2 }
 0x154   :  { %1852 = vmatpush3.bf16.msra.mxu1 %v2160_v50 }
 0x155   :  { %1853 = vmatprep.subr.bf16.mxu1 %v1978_v2 }
 0x158   :  { %1855 = vmatpush3.bf16.msra.mxu1 %v2244_v35 }
 0x159   :  { %1856 = vmatprep.subr.bf16.mxu1 %v1978_v2 }
 0x15c   :  { %1858 = vmatpush3.bf16.msra.mxu1 %v2256_v39 }
 0x15d   :  { %1681 = vmatprep.subr.bf16.mxu1 %v1950_v12 }
 0x212   :  { %v585_v49 = vpop.f32.mrb[0].mxu1 }
 0x213   :  { %v589_v51 = vrot.slane %v585_v49, 4  ;;  %v1645_v52 = vpop.f32.mrb[1].mxu1 }
 0x215   :  { %v590_v53 = vadd.f32 %v589_v51, %v585_v49 }
 0x217   :  { %v591_v54 = vrot.slane %v590_v53, 2 }
 0x219   :  { %v592_v55 = vadd.f32 %v591_v54, %v590_v53 }
 0x21b   :  { %v593_v56 = vrot.slane %v592_v55, 1 }
 0x21d   :  { %v594_v57 = vadd.f32 %v593_v56, %v592_v55 }
 0x21f   :  { %v595_v58 = vmul.f32 0.001953125, %v594_v57 }
 0x221   :  { %v596_v60 = vsub.f32 %v497_v42, %v595_v58  ;;  %v597_v61 = vsub.f32 %v500_v45, %v595_v58  ;;  %v598_v62 = vsub.f32 %v1609_v41, %v595_v58  ;;  %v599_v0 = vsub.f32 %v1610_v43, %v595_v58  ;;  %v686_v42 = vld [vmem:[%s2431_s2] sm:$0x1] }
 0x222   :  { %v690_v43 = vsub.s32 0, %v2054_v10 }
 0x223   :  { %v600_v1 = vmul.f32 %v596_v60, %v596_v60  ;;  %v601_v3 = vmul.f32 %v597_v61, %v597_v61  ;;  %v602_v4 = vmul.f32 %v598_v62, %v598_v62  ;;  %v603_v8 = vmul.f32 %v599_v0, %v599_v0 }
 0x225   :  { %v604_v5 = vadd.f32 %v601_v3, %v600_v1 }
 0x227   :  { %v605_v9 = vadd.f32 %v604_v5, %v602_v4 }
 0x229   :  { %v606_v11 = vadd.f32 %v605_v9, %v603_v8 }
 0x22b   :  { %1679 = vmatmul.mubr.f32.vlgmr.msra.gmra.mrb[2].mxu1 %v606_v11 }
 0x22c   :  { %1682 = vmatpush3.bf16.msra.mxu1 %v1950_v12 }
 0x22d   :  { %1683 = vmatprep.subr.bf16.mxu1 %v1951_v13 }
 0x230   :  { %1684 = vmatpush3.bf16.msra.mxu1 %v1951_v13  ;;  %v1960_v13 = vld [vmem:[%s2430_s4 + $0x10] sm:$0xff]  }
 0x231   :  { %1685 = vmatprep.subr.bf16.mxu1 %v1952_v14 }
 0x234   :  { %1686 = vmatpush3.bf16.msra.mxu1 %v1952_v14  ;;  %v1961_v14 = vld [vmem:[%s2430_s4 + $0x18] sm:$0xff]  }
 0x235   :  { %1687 = vmatprep.subr.bf16.mxu1 %v1953_v15 }
 0x238   :  { %1688 = vmatpush3.bf16.msra.mxu1 %v1953_v15  ;;  %v1963_v15 = vld [vmem:[%s2430_s4 + $0x28] sm:$0xff]  }
 0x239   :  { %1689 = vmatprep.subr.bf16.mxu1 %v1954_v18 }
 0x23c   :  { %1690 = vmatpush3.bf16.msra.mxu1 %v1954_v18  ;;  %v1964_v18 = vld [vmem:[%s2430_s4 + $0x30] sm:$0xff]  }
 0x23d   :  { %1691 = vmatprep.subr.bf16.mxu1 %v1955_v19 }
 0x240   :  { %1692 = vmatpush3.bf16.msra.mxu1 %v1955_v19 }
 0x241   :  { %1693 = vmatprep.subr.bf16.mxu1 %v1956_v21 }
 0x244   :  { %1694 = vmatpush3.bf16.msra.mxu1 %v1956_v21 }
 0x245   :  { %1695 = vmatprep.subr.bf16.mxu1 %v1957_v22 }
 0x248   :  { %1696 = vmatpush3.bf16.msra.mxu1 %v1957_v22 }
 0x249   :  { %1701 = vmatprep.subr.bf16.mxu1 %v1958_v24 }
 0x2fe   :  { %v673_v27 = vpop.f32.mrb[2].mxu1 }
 0x2ff   :  { %v677_v28 = vrot.slane %v673_v27, 4  ;;  %v1680_v29 = vpop.f32.mrb[3].mxu1 }
 0x301   :  { %v678_v31 = vadd.f32 %v677_v28, %v673_v27 }
 0x303   :  { %v679_v32 = vrot.slane %v678_v31, 2 }
 0x305   :  { %v680_v33 = vadd.f32 %v679_v32, %v678_v31  ;;  %v1966_v32 = vld [vmem:[%s2430_s4 + $0x80] sm:$0xff]  }
 0x307   :  { %v681_v34 = vrot.slane %v680_v33, 1 }
 0x309   :  { %v682_v37 = vadd.f32 %v681_v34, %v680_v33 }
 0x30b   :  { %v683_v38 = vmul.f32 0.001953125, %v682_v37 }
 0x30d   :  { %v684_v41 = vadd.f32 1e-05, %v683_v38 }
 0x30f   :  { %1974 = vrsqrt.f32 %v684_v41 }
 0x319   :  { %v1975_v45 = vpop.eup %1974 }
 0x31a   :  { %v687_v46 = vmul.f32 %v1975_v45, %v686_v42  ;;  %v1967_v42 = vld [vmem:[%s2430_s4 + $0x88] sm:$0xff]  }
 0x31c   :  { %v691_v47 = vrot.slane %v687_v46, %v690_v43  ;;  %v1970_v46 = vld [vmem:[%s2430_s4 + $0xa0] sm:$0xff]  }
 0x31e   :  { %v692_v49 = vmul.f32 %v691_v47, %v596_v60  ;;  %v693_v51 = vmul.f32 %v691_v47, %v597_v61  ;;  %v694_v52 = vmul.f32 %v691_v47, %v598_v62  ;;  %v695_v53 = vmul.f32 %v691_v47, %v599_v0  ;;  %v1959_v60 = vld [vmem:[%s2430_s4 + $0x8] sm:$0xff]  }
 0x31f   :  { %v1971_v47 = vld [vmem:[%s2430_s4 + $0xa8] sm:$0xff]  }
 0x320   :  { %v703_v54 = vadd.f32 %v1365_v48, %v692_v49  ;;  %v704_v55 = vadd.f32 %v1365_v48, %v693_v51  ;;  %v705_v56 = vadd.f32 %v1365_v48, %v694_v52  ;;  %v706_v57 = vadd.f32 %v1365_v48, %v695_v53  ;;  %v1972_v48 = vld [vmem:[%s2430_s4 + $0xb0] sm:$0xff]   ;;  %v1973_v51 = vld [vmem:[%s2430_s4 + $0xb8] sm:$0xff]  }
 0x322   :  { %v707_v58 = vmax.f32 %v703_v54, 0.0  ;;  %v708_v1 = vmax.f32 %v704_v55, 0.0  ;;  %v2319_v3 = vmax.f32 %v705_v56, 0.0  ;;  %v2321_v4 = vmax.f32 %v706_v57, 0.0 }
 0x324   :  { %v765_v5 = vpack.c.bf16 %v708_v1, %v707_v58  ;;  %v766_v8 = vpack.c.bf16 %v2321_v4, %v2319_v3  ;;  %v715_v9 = vrot.slane %v707_v58, 7  ;;  %v716_v11 = vrot.slane %v708_v1, 7 }
 0x325   :  { %v718_v19 = vrot.slane %v2319_v3, 7  ;;  %v732_v21 = vrot.slane %v708_v1, 1  ;;  %v734_v22 = vrot.slane %v2319_v3, 1  ;;  %v720_v29 = vrot.slane %v2321_v4, 7 }
 0x326   :  { %1697 = vmatprep.mubr.bf16.mxu1 %v765_v5  ;;  %v726_v61 = vsel %vm131_vm1, 0.0, %v715_v9  ;;  %v717_v0 = vsel %vm131_vm1, %v715_v9, %v716_v11  ;;  %v731_v33 = vrot.slane %v707_v58, 1  ;;  %v736_v49 = vrot.slane %v2321_v4, 1 }
 0x327   :  { %1698 = vmatmul.mubr.bf16.vlgmr.msra.gmra.mrb[4].mxu1 %v766_v8  ;;  %v727_v62 = vmul.f32 %v2068_v17, %v726_v61  ;;  %v1962_v17 = vld [vmem:[%s2430_s4 + $0x20] sm:$0xff]   ;;  %v719_v27 = vsel %vm131_vm1, %v716_v11, %v718_v19  ;;  %v735_v28 = vsel %vm148_vm4, %v732_v21, %v734_v22  ;;  %v721_v37 = vsel %vm131_vm1, %v718_v19, %v720_v29 }
 0x328   :  { %1702 = vmatpush3.bf16.msra.mxu1 %v1958_v24  ;;  %v1965_v24 = vld [vmem:[%s2430_s4 + $0x38] sm:$0xff]   ;;  %v729_v31 = vmul.f32 %v2176_v59, %v719_v27  ;;  %v744_v34 = vmul.f32 %v2186_v63, %v735_v28  ;;  %v733_v41 = vsel %vm148_vm4, %v731_v33, %v732_v21  ;;  %v1968_v59 = vld [vmem:[%s2430_s4 + $0x90] sm:$0xff]   ;;  %v742_v52 = vsel %vm148_vm4, %v736_v49, 0.0  ;;  %v1268_v29 = vld [vmem:[%s2433_s5] sm:$0x1] }
 0x329   :  { %1703 = vmatprep.subr.bf16.mxu1 %v1959_v60  ;;  %v747_v12 = vpack.c.bf16 %v717_v0, %v727_v62  ;;  %v1969_v63 = vld [vmem:[%s2430_s4 + $0x98] sm:$0xff]   ;;  %v746_v53 = vmul.f32 %v2217_v26, %v742_v52  ;;  %v737_v54 = vsel %vm148_vm4, %v734_v22, %v736_v49 }
 0x32a   :  { %v748_v38 = vpack.c.bf16 %v721_v37, %v729_v31  ;;  %v978_v45 = vpack.c.bf16 %v744_v34, %v733_v41  ;;  %v1422_v34 = vld [vmem:[%s2434_s6] ss:$0 sm:$0xff] }
 0x32b   :  { %1717 = vmatprep.mubr.bf16.mxu1 %v747_v12  ;;  %v979_v55 = vpack.c.bf16 %v746_v53, %v737_v54 }
 0x32c   :  { %1704 = vmatpush3.bf16.msra.mxu1 %v1959_v60 }
 0x32d   :  { %1705 = vmatprep.subr.bf16.mxu1 %v1960_v13 }
 0x330   :  { %1706 = vmatpush3.bf16.msra.mxu1 %v1960_v13 }
 0x331   :  { %1707 = vmatprep.subr.bf16.mxu1 %v1961_v14 }
 0x334   :  { %1708 = vmatpush3.bf16.msra.mxu1 %v1961_v14 }
 0x335   :  { %1709 = vmatprep.subr.bf16.mxu1 %v1962_v17 }
 0x338   :  { %1710 = vmatpush3.bf16.msra.mxu1 %v1962_v17 }
 0x339   :  { %1711 = vmatprep.subr.bf16.mxu1 %v1963_v15 }
 0x33c   :  { %1712 = vmatpush3.bf16.msra.mxu1 %v1963_v15 }
 0x33d   :  { %1713 = vmatprep.subr.bf16.mxu1 %v1964_v18 }
 0x340   :  { %1714 = vmatpush3.bf16.msra.mxu1 %v1964_v18 }
 0x341   :  { %1715 = vmatprep.subr.bf16.mxu1 %v1965_v24 }
 0x344   :  { %1716 = vmatpush3.bf16.msra.mxu1 %v1965_v24 }
 0x345   :  { %1721 = vmatprep.subr.bf16.mxu1 %v1966_v32 }
 0x347   :  { %1718 = vmatmul.mubr.bf16.vlgmr.msra.gmra.mrb[4].mxu1 %v748_v38 }
 0x348   :  { %1722 = vmatpush3.bf16.msra.mxu1 %v1966_v32  ;;  %1737 = vmatprep.mubr.bf16.mxu1 %v978_v45 }
 0x349   :  { %1723 = vmatprep.subr.bf16.mxu1 %v1967_v42 }
 0x34c   :  { %1724 = vmatpush3.bf16.msra.mxu1 %v1967_v42 }
 0x34d   :  { %1725 = vmatprep.subr.bf16.mxu1 %v1968_v59 }
 0x350   :  { %1726 = vmatpush3.bf16.msra.mxu1 %v1968_v59 }
 0x351   :  { %1727 = vmatprep.subr.bf16.mxu1 %v1969_v63 }
 0x354   :  { %1728 = vmatpush3.bf16.msra.mxu1 %v1969_v63 }
 0x355   :  { %1729 = vmatprep.subr.bf16.mxu1 %v1970_v46 }
 0x358   :  { %1730 = vmatpush3.bf16.msra.mxu1 %v1970_v46 }
 0x359   :  { %1731 = vmatprep.subr.bf16.mxu1 %v1971_v47 }
 0x35c   :  { %1732 = vmatpush3.bf16.msra.mxu1 %v1971_v47 }
 0x35d   :  { %1733 = vmatprep.subr.bf16.mxu1 %v1972_v48 }
 0x360   :  { %1734 = vmatpush3.bf16.msra.mxu1 %v1972_v48 }
 0x361   :  { %1735 = vmatprep.subr.bf16.mxu1 %v1973_v51 }
 0x364   :  { %1736 = vmatpush3.bf16.msra.mxu1 %v1973_v51 }
 0x367   :  { %1738 = vmatmul.mubr.bf16.vlgmr.msra.gmra.mrb[4].mxu1 %v979_v55 }
 0x43a   :  { %v1739_v56 = vpop.f32.mrb[4].mxu1 }
 0x43b   :  { %v1079_v57 = vpop.f32.mrb[5].mxu1 }
 0x43c   :  { %v1740_v58 = vpop.f32.mrb[6].mxu1 }
 0x43d   :  { %v1082_v1 = vpop.f32.mrb[7].mxu1 }
 0x43e   :  { %v1098_v3 = vadd.f32 %v1082_v1, %v1079_v57 }
 0x440   :  { %v1099_v4 = vadd.f32 %v1739_v56, %v1098_v3 }
 0x442   :  { %v1100_v5 = vadd.f32 %v1740_v58, %v1099_v4 }
 0x444   :  { %1774 = vmatmul.mubr.f32.vlgmr.msra.gmra.mrb[4].mxu0 %v1100_v5 }
 0x445   :  { %1885 = vmatpush3.bf16.msra.mxu0 %v2089_v25  ;;  %1808 = vmatprep.mubr.msk.f32.mxu0 %vm1980_vm6, %v1979_v16 }
 0x446   :  { %1886 = vmatprep.subr.bf16.mxu0 %v1978_v2 }
 0x449   :  { %1888 = vmatpush3.bf16.msra.mxu0 %v2104_v30 }
 0x44a   :  { %1889 = vmatprep.subr.bf16.mxu0 %v1978_v2 }
 0x44d   :  { %1891 = vmatpush3.bf16.msra.mxu0 %v2119_v36 }
 0x44e   :  { %1892 = vmatprep.subr.bf16.mxu0 %v1978_v2 }
 0x451   :  { %1894 = vmatpush3.bf16.msra.mxu0 %v2132_v40 }
 0x452   :  { %1895 = vmatprep.subr.bf16.mxu0 %v1978_v2 }
 0x455   :  { %1897 = vmatpush3.bf16.msra.mxu0 %v2145_v44 }
 0x456   :  { %1898 = vmatprep.subr.bf16.mxu0 %v1978_v2 }
 0x459   :  { %1900 = vmatpush3.bf16.msra.mxu0 %v2160_v50 }
 0x45a   :  { %1901 = vmatprep.subr.bf16.mxu0 %v1978_v2 }
 0x45d   :  { %1903 = vmatpush3.bf16.msra.mxu0 %v2244_v35 }
 0x45e   :  { %1904 = vmatprep.subr.bf16.mxu0 %v1978_v2 }
 0x461   :  { %1906 = vmatpush3.bf16.msra.mxu0 %v2256_v39 }
 0x517   :  { %v1167_v16 = vpop.f32.mrb[4].mxu0 }
 0x518   :  { %v1171_v25 = vrot.slane %v1167_v16, 4  ;;  %v1775_v30 = vpop.f32.mrb[5].mxu0 }
 0x51a   :  { %v1172_v36 = vadd.f32 %v1171_v25, %v1167_v16 }
 0x51c   :  { %v1173_v40 = vrot.slane %v1172_v36, 2 }
 0x51e   :  { %v1174_v26 = vadd.f32 %v1173_v40, %v1172_v36 }
 0x520   :  { %v1175_v8 = vrot.slane %v1174_v26, 1 }
 0x522   :  { %v1176_v44 = vadd.f32 %v1175_v8, %v1174_v26 }
 0x524   :  { %v1177_v9 = vmul.f32 0.001953125, %v1176_v44 }
 0x526   :  { %v1178_v11 = vsub.f32 %v1079_v57, %v1177_v9  ;;  %v1179_v60 = vsub.f32 %v1082_v1, %v1177_v9  ;;  %v1180_v50 = vsub.f32 %v1739_v56, %v1177_v9  ;;  %v1181_v61 = vsub.f32 %v1740_v58, %v1177_v9 }
 0x528   :  { %v1182_v62 = vmul.f32 %v1178_v11, %v1178_v11  ;;  %v1183_v0 = vmul.f32 %v1179_v60, %v1179_v60  ;;  %v1184_v35 = vmul.f32 %v1180_v50, %v1180_v50  ;;  %v1185_v2 = vmul.f32 %v1181_v61, %v1181_v61 }
 0x52a   :  { %v1186_v12 = vadd.f32 %v1183_v0, %v1182_v62 }
 0x52c   :  { %v1187_v13 = vadd.f32 %v1186_v12, %v1184_v35 }
 0x52e   :  { %v1188_v39 = vadd.f32 %v1187_v13, %v1185_v2 }
 0x530   :  { %1809 = vmatmul.mubr.f32.vlgmr.msra.gmra.mrb[6].mxu0 %v1188_v39 }
 0x603   :  { %v1255_v14 = vpop.f32.mrb[6].mxu0 }
 0x604   :  { %v1259_v17 = vrot.slane %v1255_v14, 4  ;;  %v1810_v15 = vpop.f32.mrb[7].mxu0 }
 0x606   :  { %v1260_v18 = vadd.f32 %v1259_v17, %v1255_v14 }
 0x608   :  { %v1261_v19 = vrot.slane %v1260_v18, 2 }
 0x60a   :  { %v1262_v21 = vadd.f32 %v1261_v19, %v1260_v18 }
 0x60c   :  { %v1263_v22 = vrot.slane %v1262_v21, 1 }
 0x60e   :  { %v1264_v24 = vadd.f32 %v1263_v22, %v1262_v21 }
 0x610   :  { %v1265_v27 = vmul.f32 0.001953125, %v1264_v24 }
 0x612   :  { %v1266_v28 = vadd.f32 1e-05, %v1265_v27 }
 0x614   :  { %1976 = vrsqrt.f32 %v1266_v28 }
 0x61e   :  { %v1977_v31 = vpop.eup %1976 }
 0x61f   :  { %v1269_v32 = vmul.f32 %v1977_v31, %v1268_v29 }
 0x621   :  { %v1273_v33 = vrot.slane %v1269_v32, %v690_v43 }
 0x623   :  { %v1274_v37 = vmul.f32 %v1273_v33, %v1178_v11  ;;  %v1275_v38 = vmul.f32 %v1273_v33, %v1179_v60  ;;  %v1276_v41 = vmul.f32 %v1273_v33, %v1180_v50  ;;  %v1277_v42 = vmul.f32 %v1273_v33, %v1181_v61 }
 0x625   :  { %v1285_v45 = vadd.f32 %v1422_v34, %v1274_v37  ;;  %v1286_v59 = vadd.f32 %v1422_v34, %v1275_v38  ;;  %v1287_v63 = vadd.f32 %v1422_v34, %v1276_v41  ;;  %v1288_v46 = vadd.f32 %v1422_v34, %v1277_v42 }
 0x627   :  { %v1289_v47 = vadd.f32 %v1285_v45, %v2042_v6  ;;  %v1290_v48 = vadd.f32 %v1286_v59, %v2047_v7  ;;  %v1291_v49 = vadd.f32 %v1287_v63, %v2075_v20  ;;  %v1292_v10 = vadd.f32 %v1288_v46, %v2086_v23 }
 0x629   :  { %v1293_v43 = vmax.f32 %v1289_v47, 0.0  ;;  %v1294_v51 = vmax.f32 %v1290_v48, 0.0  ;;  %v1295_v52 = vmax.f32 %v1291_v49, 0.0  ;;  %v1296_v53 = vmax.f32 %v1292_v10, 0.0 }
 0x62b   :  { %1297 = vst [vmem:[%s2435_s8] sm:$0xff] %v1293_v43  ;;  %1298 = vst [vmem:[%s2435_s8 + $0x8] sm:$0xff] %v1294_v51 }
 0x62c   :  { %1299 = vst [vmem:[%s2435_s8 + $0x10] sm:$0xff] %v1295_v52  ;;  %1300 = vst [vmem:[%s2435_s8 + $0x18] sm:$0xff] %v1296_v53 }

</bundles_post_ra>
